<compile_context>
chip_gen: v7x
topology: tpu7x:2x2x1
jax: 0.10.0
libtpu: 0.0.40
codegen_flags: <defaults>
</compile_context>

<pallas_src>
import functools
import math

import jax
import jax.numpy as jnp
from jax.experimental import pallas as pl
from jax.experimental.pallas import tpu as pltpu

_NEG_INF = -1e30        # large finite negative: masks positions without NaN rows
_MIB = 1 << 20


def _sublane_multiple(dtype):
    """Packed sublane tiling: 8 for 4-byte, 16 for bf16/f16, 32 for int8/fp8."""
    return max(8, 32 // jnp.dtype(dtype).itemsize)


def _pick_block(dim, target, multiple):
    """Largest tile <= target that divides dim and is a multiple of `multiple`.
    Falls back to the full dimension (always a legal block shape)."""
    if dim <= target:
        return dim
    cand = (target // multiple) * multiple
    while cand >= multiple:
        if dim % cand == 0:
            return cand
        cand -= multiple
    return dim


def _shrink(dim, cur, multiple):
    """One halving step of a tile size; only accepts strictly smaller tiles."""
    cand = _pick_block(dim, max(cur // 2, multiple), multiple)
    return cand if cand < cur else cur


# ---------------------------------------------------------------------------
# Kernel bodies
# ---------------------------------------------------------------------------
def _attn_kernel(*refs, inv_scale, with_mask):
    """Module-equivalent kernel: writes both attn (tq, Lk) and out (tq, Dv)."""
    if with_mask:
        q_ref, k_ref, v_ref, mask_ref, attn_ref, out_ref = refs
    else:
        q_ref, k_ref, v_ref, attn_ref, out_ref = refs
        mask_ref = None

    # Fold 1/scale into the (tq, Dk) q tile instead of the (tq, Lk) scores.
    q = (q_ref[0].astype(jnp.float32) * inv_scale).astype(q_ref.dtype)
    k = k_ref[0]
    v = v_ref[0]

    # scores[i, j] = sum_d q[i, d] * k[j, d]   (contract last dims, no transpose)
    s = jax.lax.dot_general(q, k, (((1,), (1,)), ((), ())),
                            preferred_element_type=jnp.float32)
    if mask_ref is not None:
        # In-kernel compare+select on the 1-byte mask (free under MXU/DMA).
        s = jnp.where(mask_ref[0] != 0, _NEG_INF, s)

    # Numerically stable softmax over the key axis (f32: attn is returned).
    s_max = jnp.max(s, axis=-1, keepdims=True)
    e = jnp.exp(s - s_max)
    denom = jnp.sum(e, axis=-1, keepdims=True)
    attn = e * pl.reciprocal(denom, approx=False)

    out = jnp.dot(attn.astype(v.dtype), v, preferred_element_type=jnp.float32)

    attn_ref[0] = attn.astype(attn_ref.dtype)
    out_ref[0] = out.astype(out_ref.dtype)


def _flash_kernel(*refs, inv_scale, with_mask, exp_dtype, recip_approx):
    """Flash / online-softmax kernel: output only, no dense attention matrix."""
    if with_mask:
        (q_ref, k_ref, v_ref, mask_ref, out_ref,
         qs_sc, m_sc, l_sc, acc_sc) = refs
    else:
        q_ref, k_ref, v_ref, out_ref, qs_sc, m_sc, l_sc, acc_sc = refs
        mask_ref = None

    kv = pl.program_id(2)

    @pl.when(kv == 0)
    def _():
        # q scaling hoisted out of the kv loop: done once per (batch, q-tile).
        qs_sc[...] = (q_ref[0].astype(jnp.float32) * inv_scale).astype(qs_sc.dtype)
        m_sc[...] = jnp.full(m_sc.shape, -jnp.inf, jnp.float32)
        l_sc[...] = jnp.zeros(l_sc.shape, jnp.float32)
        acc_sc[...] = jnp.zeros(acc_sc.shape, jnp.float32)

    q = qs_sc[...]
    k = k_ref[0]
    v = v_ref[0]

    s = jax.lax.dot_general(q, k, (((1,), (1,)), ((), ())),
                            preferred_element_type=jnp.float32)
    if mask_ref is not None:
        s = jnp.where(mask_ref[0] != 0, _NEG_INF, s)

    m_prev = m_sc[...]                                        # (tq, 128) lane-replicated
    m_new = jnp.maximum(m_prev, jnp.max(s, axis=-1, keepdims=True))
    alpha = jnp.exp(m_prev - m_new)                           # (tq, 128) lane-replicated
    p = jnp.exp((s - m_new[:, 0:1]).astype(exp_dtype))        # (tq, tk)
    l_sc[...] = alpha * l_sc[...] + jnp.sum(p, axis=-1, keepdims=True,
                                            dtype=jnp.float32)
    acc_sc[...] = acc_sc[...] * alpha[:, 0:1] + jnp.dot(
        p.astype(v.dtype), v, preferred_element_type=jnp.float32)
    m_sc[...] = m_new

    @pl.when(kv == pl.num_programs(2) - 1)
    def _():
        # Normalize the (tq, Dv) accumulator, not the (tq, Lk) probabilities.
        inv_l = pl.reciprocal(l_sc[...], approx=recip_approx)  # lanes identical
        out_ref[0] = (acc_sc[...] * inv_l[:, 0:1]).astype(out_ref.dtype)


# ---------------------------------------------------------------------------
# pallas_call wrappers
# ---------------------------------------------------------------------------
def _attn_call(q, k, v, mask_i8, inv_scale, q_block, vmem_budget):
    B, Lq, Dk = q.shape
    _, Lk, Dv = v.shape
    dt = q.dtype.itemsize
    with_mask = mask_i8 is not None
    mb = 1 if with_mask else 0

    sub = _sublane_multiple(q.dtype)
    if with_mask:
        sub = max(sub, _sublane_multiple(mask_i8.dtype))
    tq = _pick_block(Lq, q_block, sub)

    def est(tq_):
        by = 2 * tq_ * Dk * dt             # q tile (double-buffered)
        by += 2 * Lk * (Dk + Dv) * dt      # full K + V resident (x2 buffers)
        by += 2 * tq_ * Lk * dt            # attn output tile
        by += 2 * tq_ * Dv * dt            # output tile
        by += 2 * tq_ * Lk * mb            # mask tile
        by += 3 * tq_ * Lk * 4             # f32 scores / exp temporaries
        return by

    # VMEM-budgeted tq (64 MiB default keeps v7x / default scoped limits happy).
    while est(tq) > vmem_budget and tq > sub:
        new_tq = _shrink(Lq, tq, sub)
        if new_tq == tq:
            break
        tq = new_tq

    nq = Lq // tq
    vmem_limit = int(max(32 * _MIB, min(est(tq) + (est(tq) >> 2), 128 * _MIB)))

    in_specs = [
        pl.BlockSpec((1, tq, Dk), lambda b, i: (b, i, 0)),
        pl.BlockSpec((1, Lk, Dk), lambda b, i: (b, 0, 0)),   # resident per batch elem
        pl.BlockSpec((1, Lk, Dv), lambda b, i: (b, 0, 0)),
    ]
    args = [q, k, v]
    if with_mask:
        in_specs.append(pl.BlockSpec((1, tq, Lk), lambda b, i: (b, i, 0)))
        args.append(mask_i8)

    cost = pl.CostEstimate(
        flops=2 * B * Lq * Lk * (Dk + Dv),
        transcendentals=B * Lq * Lk,
        bytes_accessed=int(B * (Lq * Dk + Lk * (Dk + Dv) + Lq * Lk + Lq * Dv) * dt
                           + B * Lq * Lk * mb),
    )

    kernel = functools.partial(_attn_kernel, inv_scale=inv_scale,
                               with_mask=with_mask)
    attn, out = pl.pallas_call(
        kernel,
        out_shape=(
            jax.ShapeDtypeStruct((B, Lq, Lk), q.dtype),
            jax.ShapeDtypeStruct((B, Lq, Dv), q.dtype),
        ),
        grid_spec=pltpu.PrefetchScalarGridSpec(
            num_scalar_prefetch=0,
            grid=(B, nq),
            in_specs=in_specs,
            out_specs=[
                pl.BlockSpec((1, tq, Lk), lambda b, i: (b, i, 0)),
                pl.BlockSpec((1, tq, Dv), lambda b, i: (b, i, 0)),
            ],
        ),
        compiler_params=pltpu.CompilerParams(
            dimension_semantics=("parallel", "parallel"),
            vmem_limit_bytes=vmem_limit),
        cost_estimate=cost,
    )(*args)
    return attn, out


def _flash_call(q, k, v, mask_i8, inv_scale, q_block, kv_block, vmem_budget,
                exp_dtype, recip_approx):
    B, Lq, Dk = q.shape
    _, Lk, Dv = v.shape
    dt = q.dtype.itemsize
    with_mask = mask_i8 is not None
    mb = 1 if with_mask else 0

    sub = _sublane_multiple(q.dtype)
    if with_mask:
        sub = max(sub, _sublane_multiple(mask_i8.dtype))
    tq = _pick_block(Lq, q_block, sub)     # big q tile: K/V re-stream intensity ~tq
    tk = _pick_block(Lk, kv_block, 128)    # long kv tile: fewer rescale passes

    def est(tq_, tk_):
        by = 2 * tq_ * Dk * dt             # q tile
        by += 2 * tk_ * (Dk + Dv) * dt     # K + V tiles
        by += 2 * tq_ * Dv * dt            # out tile
        by += 2 * tq_ * tk_ * mb           # mask tile
        by += tq_ * Dk * dt                # pre-scaled q scratch
        by += (2 * 128 + Dv) * tq_ * 4     # m, l, acc scratch (f32)
        by += 3 * tq_ * tk_ * 4            # f32 scores / probs temporaries
        return by

    while est(tq, tk) > vmem_budget:
        new_tk = _shrink(Lk, tk, 128) if tk > 128 else tk
        if new_tk != tk:
            tk = new_tk
            continue
        new_tq = _shrink(Lq, tq, sub) if tq > sub else tq
        if new_tq == tq:
            break
        tq = new_tq

    nq, nk = Lq // tq, Lk // tk
    vmem_limit = int(max(32 * _MIB,
                         min(est(tq, tk) + (est(tq, tk) >> 2), 128 * _MIB)))

    in_specs = [
        pl.BlockSpec((1, tq, Dk), lambda b, i, j: (b, i, 0)),
        pl.BlockSpec((1, tk, Dk), lambda b, i, j: (b, j, 0)),
        pl.BlockSpec((1, tk, Dv), lambda b, i, j: (b, j, 0)),
    ]
    args = [q, k, v]
    if with_mask:
        in_specs.append(pl.BlockSpec((1, tq, tk), lambda b, i, j: (b, i, j)))
        args.append(mask_i8)

    cost = pl.CostEstimate(
        flops=2 * B * Lq * Lk * (Dk + Dv),
        transcendentals=B * Lq * Lk,
        bytes_accessed=int(B * Lq * (Dk + Dv) * dt
                           + nq * B * Lk * (Dk + Dv) * dt
                           + B * Lq * Lk * mb),
    )

    kernel = functools.partial(_flash_kernel, inv_scale=inv_scale,
                               with_mask=with_mask, exp_dtype=exp_dtype,
                               recip_approx=recip_approx)
    out = pl.pallas_call(
        kernel,
        out_shape=jax.ShapeDtypeStruct((B, Lq, Dv), q.dtype),
        grid_spec=pltpu.PrefetchScalarGridSpec(
            num_scalar_prefetch=0,
            grid=(B, nq, nk),
            in_specs=in_specs,
            out_specs=pl.BlockSpec((1, tq, Dv), lambda b, i, j: (b, i, 0)),
            scratch_shapes=[
                pltpu.VMEM((tq, Dk), q.dtype),        # pre-scaled q (hoisted)
                pltpu.VMEM((tq, 128), jnp.float32),   # running max m (lane-replicated)
                pltpu.VMEM((tq, 128), jnp.float32),   # running sum l (lane-replicated)
                pltpu.VMEM((tq, Dv), jnp.float32),    # output accumulator
            ],
        ),
        compiler_params=pltpu.CompilerParams(
            dimension_semantics=("parallel", "parallel", "arbitrary"),
            vmem_limit_bytes=vmem_limit),
        cost_estimate=cost,
    )(*args)
    return out


def scaled_dot_product_attention(q, k, v, mask=None, scale=None,
                                 return_attn=True, q_block=512, kv_block=1024,
                                 vmem_budget_bytes=64 * _MIB, bf16_exp=None):
    """Pallas TPU port of ScaledDotProductAttention.forward.

    q: (B, Lq, Dk), k: (B, Lk, Dk), v: (B, Lk, Dv); mask: optional (B, Lq, Lk),
    True/nonzero == masked out.  Returns (attn, output) if return_attn else output.
    Note: fully-masked rows produce ~uniform attention (finite -1e30 fill) instead
    of NaN as torch's softmax(-inf) would.
    """
    if scale is None:
        scale = math.sqrt(q.shape[-1])
    inv_scale = 1.0 / float(scale)

    mask_i8 = None
    if mask is not None:
        # No bf16-bias expansion pass: kernels stream the 1-byte mask and do the
        # compare+select themselves.  bool -> int8 only because Mosaic i1 memrefs
        # are not portable; pass an int8 mask to skip even that cast.
        mask_i8 = mask if mask.dtype == jnp.int8 else mask.astype(jnp.int8)

    if return_attn:
        return _attn_call(q, k, v, mask_i8, inv_scale, q_block, vmem_budget_bytes)

    # bf16 exponentials: EUP relief on v6e/v7x; auto-off for f32 inputs.
    # Set bf16_exp=False explicitly on v5e (no bf16 EUP/VPU).
    if bf16_exp is None:
        bf16_exp = q.dtype == jnp.bfloat16
    exp_dtype = jnp.bfloat16 if bf16_exp else jnp.float32
    recip_approx = q.dtype != jnp.float32   # exact 1/l for f32 outputs
    return _flash_call(q, k, v, mask_i8, inv_scale, q_block, kv_block,
                       vmem_budget_bytes, exp_dtype, recip_approx)


# ---------------------------------------------------------------------------
# Reference + demo
# ---------------------------------------------------------------------------
def _reference(q, k, v, mask, scale):
    scores = jnp.einsum("bqd,bkd->bqk", q, k) / scale
    if mask is not None:
        scores = jnp.where(mask, -jnp.inf, scores)
    attn = jax.nn.softmax(scores, axis=-1)
    out = jnp.einsum("bqk,bkd->bqd", attn, v)
    return attn, out


if __name__ == "__main__":
    # Shapes from the original module demo.
    batch_size, len_q, len_k, d_k, d_v = 2, 3, 4, 128, 64
    scale = math.sqrt(d_k)

    key = jax.random.PRNGKey(0)
    kq, kk, kvv = jax.random.split(key, 3)
    q = jax.random.normal(kq, (batch_size, len_q, d_k), dtype=jnp.float32)
    k = jax.random.normal(kk, (batch_size, len_k, d_k), dtype=jnp.float32)
    v = jax.random.normal(kvv, (batch_size, len_k, d_v), dtype=jnp.float32)
    mask = jnp.zeros((batch_size, len_q, len_k), dtype=bool)  # module demo: all visible

    ref_attn, ref_out = _reference(q, k, v, mask, scale)

    # Module-equivalent path: returns (attn, output); mask streamed as 1-byte tiles.
    attn, out = scaled_dot_product_attention(q, k, v, mask, scale)
    jax.block_until_ready((attn, out))
    assert jnp.allclose(attn, ref_attn, atol=1e-4, rtol=1e-4)
    assert jnp.allclose(out, ref_out, atol=1e-4, rtol=1e-4)

    # Fast path: flash / online-softmax kernel, no attention matrix written to HBM.
    out_fast = scaled_dot_product_attention(q, k, v, mask, scale, return_attn=False)
    jax.block_until_ready(out_fast)
    assert jnp.allclose(out_fast, ref_out, atol=1e-4, rtol=1e-4)

    # Maskless fast path: no mask operand is materialized or DMA'd at all.
    out_nomask = scaled_dot_product_attention(q, k, v, None, scale, return_attn=False)
    jax.block_until_ready(out_nomask)
    assert jnp.allclose(out_nomask, ref_out, atol=1e-4, rtol=1e-4)

    # Multi-tile flash check: several q and kv tiles with a random (non-degenerate)
    # mask, exercising the online-softmax carry across kv steps.
    B2, Lq2, Lk2 = 2, 64, 256
    k2q, k2k, k2v, k2m = jax.random.split(jax.random.PRNGKey(1), 4)
    q2 = jax.random.normal(k2q, (B2, Lq2, d_k), dtype=jnp.float32)
    k2 = jax.random.normal(k2k, (B2, Lk2, d_k), dtype=jnp.float32)
    v2 = jax.random.normal(k2v, (B2, Lk2, d_v), dtype=jnp.float32)
    m2 = jax.random.bernoulli(k2m, 0.3, (B2, Lq2, Lk2))
    m2 = m2.at[..., 0].set(False)          # keep at least one visible key per row
    _, ref2_out = _reference(q2, k2, v2, m2, scale)
    out2 = scaled_dot_product_attention(q2, k2, v2, m2, scale, return_attn=False,
                                        q_block=32, kv_block=128)
    jax.block_until_ready(out2)
    assert jnp.allclose(out2, ref2_out, atol=1e-4, rtol=1e-4)

    print("KERNEL_OK")
</pallas_src>

<mosaic_0001>
module attributes {stable_mosaic.version = 11 : i64} {
  func.func @_attn_kernel(%arg0: i32, %arg1: i32, %arg2: memref<1x3x128xf32, #tpu.memory_space<vmem>>, %arg3: memref<1x4x128xf32, #tpu.memory_space<vmem>>, %arg4: memref<1x4x64xf32, #tpu.memory_space<vmem>>, %arg5: memref<1x3x4xi8, #tpu.memory_space<vmem>>, %arg6: memref<1x3x4xf32, #tpu.memory_space<vmem>>, %arg7: memref<1x3x64xf32, #tpu.memory_space<vmem>>) attributes {dimension_semantics = [#tpu.dimension_semantics<parallel>, #tpu.dimension_semantics<parallel>], iteration_bounds = array<i64: 2, 1>, scalar_prefetch = 0 : i64, scratch_operands = 0 : i64, tpu.core_type = #tpu.core_type<tc>, window_params = [{transform_indices = @transform_0, window_bounds = array<i64: 1, 3, 128>}, {transform_indices = @transform_1, window_bounds = array<i64: 1, 4, 128>}, {transform_indices = @transform_2, window_bounds = array<i64: 1, 4, 64>}, {transform_indices = @transform_3, window_bounds = array<i64: 1, 3, 4>}, {transform_indices = @transform_4, window_bounds = array<i64: 1, 3, 4>}, {transform_indices = @transform_5, window_bounds = array<i64: 1, 3, 64>}]} {
    %c0 = arith.constant 0 : index
    %c0_0 = arith.constant 0 : index
    %c0_1 = arith.constant 0 : index
    %0 = vector.load %arg2[%c0, %c0_0, %c0_1] : memref<1x3x128xf32, #tpu.memory_space<vmem>>, vector<1x3x128xf32>
    %1 = vector.shape_cast %0 : vector<1x3x128xf32> to vector<3x128xf32>
    %cst = arith.constant 0.0883883461 : f32
    %2 = vector.broadcast %cst : f32 to vector<3x128xf32>
    %3 = arith.mulf %1, %2 : vector<3x128xf32>
    %c0_2 = arith.constant 0 : index
    %c0_3 = arith.constant 0 : index
    %c0_4 = arith.constant 0 : index
    %4 = vector.load %arg3[%c0_2, %c0_3, %c0_4] : memref<1x4x128xf32, #tpu.memory_space<vmem>>, vector<1x4x128xf32>
    %5 = vector.shape_cast %4 : vector<1x4x128xf32> to vector<4x128xf32>
    %c0_5 = arith.constant 0 : index
    %c0_6 = arith.constant 0 : index
    %c0_7 = arith.constant 0 : index
    %6 = vector.load %arg4[%c0_5, %c0_6, %c0_7] : memref<1x4x64xf32, #tpu.memory_space<vmem>>, vector<1x4x64xf32>
    %7 = vector.shape_cast %6 : vector<1x4x64xf32> to vector<4x64xf32>
    %cst_8 = arith.constant dense<0.000000e+00> : vector<3x4xf32>
    %8 = tpu.matmul %3, %5, %cst_8 {dimension_numbers = #tpu.dot_dimension_numbers<[1], [1], [0], [0], [0, 0, 1, 0], [], []>} : vector<3x128xf32>, vector<4x128xf32>, vector<3x4xf32> -> vector<3x4xf32>
    %c0_9 = arith.constant 0 : index
    %c0_10 = arith.constant 0 : index
    %c0_11 = arith.constant 0 : index
    %9 = vector.load %arg5[%c0_9, %c0_10, %c0_11] : memref<1x3x4xi8, #tpu.memory_space<vmem>>, vector<1x3x4xi8>
    %10 = vector.shape_cast %9 : vector<1x3x4xi8> to vector<3x4xi8>
    %c0_i8 = arith.constant 0 : i8
    %11 = vector.broadcast %c0_i8 : i8 to vector<3x4xi8>
    %12 = arith.cmpi ne, %10, %11 : vector<3x4xi8>
    %cst_12 = arith.constant -1.000000e+30 : f32
    %13 = vector.broadcast %cst_12 : f32 to vector<3x4xf32>
    %14 = arith.select %12, %13, %8 : vector<3x4xi1>, vector<3x4xf32>
    %cst_13 = arith.constant dense<0xFF800000> : vector<3xf32>
    %15 = vector.multi_reduction <maximumf>, %14, %cst_13 [1] : vector<3x4xf32> to vector<3xf32>
    %16 = vector.shape_cast %15 : vector<3xf32> to vector<3x1xf32>
    %17 = vector.broadcast %16 : vector<3x1xf32> to vector<3x4xf32>
    %18 = arith.subf %14, %17 : vector<3x4xf32>
    %19 = math.exp %18 : vector<3x4xf32>
    %cst_14 = arith.constant dense<0.000000e+00> : vector<3xf32>
    %20 = vector.multi_reduction <add>, %19, %cst_14 [1] : vector<3x4xf32> to vector<3xf32>
    %21 = vector.shape_cast %20 : vector<3xf32> to vector<3x1xf32>
    %22 = tpu.reciprocal %21 : vector<3x1xf32> -> vector<3x1xf32>
    %23 = vector.broadcast %22 : vector<3x1xf32> to vector<3x4xf32>
    %24 = arith.mulf %19, %23 : vector<3x4xf32>
    %cst_15 = arith.constant dense<0.000000e+00> : vector<3x64xf32>
    %25 = tpu.matmul %24, %7, %cst_15 {dimension_numbers = #tpu.dot_dimension_numbers<[1], [0], [0], [1], [0, 0, 1, 1], [], []>} : vector<3x4xf32>, vector<4x64xf32>, vector<3x64xf32> -> vector<3x64xf32>
    %c0_16 = arith.constant 0 : index
    %c0_17 = arith.constant 0 : index
    %c0_18 = arith.constant 0 : index
    %26 = vector.load %arg6[%c0_16, %c0_17, %c0_18] : memref<1x3x4xf32, #tpu.memory_space<vmem>>, vector<1x3x4xf32>
    %27 = vector.shape_cast %26 : vector<1x3x4xf32> to vector<3x4xf32>
    %28 = vector.shape_cast %24 : vector<3x4xf32> to vector<1x3x4xf32>
    tpu.vector_store %arg6[%c0_16, %c0_17, %c0_18], %28 {strides = array<i32>} : memref<1x3x4xf32, #tpu.memory_space<vmem>>, vector<1x3x4xf32>,
    %c0_19 = arith.constant 0 : index
    %c0_20 = arith.constant 0 : index
    %c0_21 = arith.constant 0 : index
    %29 = vector.load %arg7[%c0_19, %c0_20, %c0_21] : memref<1x3x64xf32, #tpu.memory_space<vmem>>, vector<1x3x64xf32>
    %30 = vector.shape_cast %29 : vector<1x3x64xf32> to vector<3x64xf32>
    %31 = vector.shape_cast %25 : vector<3x64xf32> to vector<1x3x64xf32>
    tpu.vector_store %arg7[%c0_19, %c0_20, %c0_21], %31 {strides = array<i32>} : memref<1x3x64xf32, #tpu.memory_space<vmem>>, vector<1x3x64xf32>,
    return
  }
  func.func @transform_0(%arg0: i32, %arg1: i32) -> (i32, i32, i32) {
    %c0_i32 = arith.constant 0 : i32
    %c0_i32_0 = arith.constant 0 : i32
    return %arg0, %arg1, %c0_i32 : i32, i32, i32
  }
  func.func @transform_1(%arg0: i32, %arg1: i32) -> (i32, i32, i32) {
    %c0_i32 = arith.constant 0 : i32
    %c0_i32_0 = arith.constant 0 : i32
    %c0_i32_1 = arith.constant 0 : i32
    return %arg0, %c0_i32, %c0_i32_0 : i32, i32, i32
  }
  func.func @transform_2(%arg0: i32, %arg1: i32) -> (i32, i32, i32) {
    %c0_i32 = arith.constant 0 : i32
    %c0_i32_0 = arith.constant 0 : i32
    %c0_i32_1 = arith.constant 0 : i32
    return %arg0, %c0_i32, %c0_i32_0 : i32, i32, i32
  }
  func.func @transform_3(%arg0: i32, %arg1: i32) -> (i32, i32, i32) {
    %c0_i32 = arith.constant 0 : i32
    %c0_i32_0 = arith.constant 0 : i32
    return %arg0, %arg1, %c0_i32 : i32, i32, i32
  }
  func.func @transform_4(%arg0: i32, %arg1: i32) -> (i32, i32, i32) {
    %c0_i32 = arith.constant 0 : i32
    %c0_i32_0 = arith.constant 0 : i32
    return %arg0, %arg1, %c0_i32 : i32, i32, i32
  }
  func.func @transform_5(%arg0: i32, %arg1: i32) -> (i32, i32, i32) {
    %c0_i32 = arith.constant 0 : i32
    %c0_i32_0 = arith.constant 0 : i32
    return %arg0, %arg1, %c0_i32 : i32, i32, i32
  }
}

</mosaic_0001>

<bundles_post_ra>
// kernel: tpu_custom_call.1
= control target key start
LH: loop header
LB: loop body
LE: loop exit
PB: predicated region body
PF: predicated region fallthrough
CT: control target
= control target key end

     0   :  { %s771_s18 = smov 0   ;;  %s773_s19 = smov 0   ;;  %s826_s0 = inlined_call_operand.vmem [shape: f32[2,3,128], index: 0, kind: input, shape index: {}]   ;;  %s827_s1 = inlined_call_operand.vmem [shape: f32[2,4,128], index: 1, kind: input, shape index: {}]   ;;  %s828_s2 = inlined_call_operand.vmem [shape: f32[2,4,64], index: 2, kind: input, shape index: {}]   ;;  %s829_s3 = inlined_call_operand.vmem [shape: s8[2,3,4], index: 3, kind: input, shape index: {}]   ;;  %s830_s4 = inlined_call_operand.vmem [shape: f32[2,3,4], index: 4, kind: output, shape index: {0}]   ;;  %s831_s5 = inlined_call_operand.vmem [shape: f32[2,3,64], index: 5, kind: output, shape index: {1}]  }
   0x1   :  { %s775_s20 = smov 0  }
   0x2 LB: > { %s28_s21 = sadd.s32 1, %s732_s19  ;;  %p659_p0 = scmp.ge.s32.totalorder %s736_s20, 1  ;;  %s736_s20 = sphi %s775_s20, %s16_s20   ;;  %s732_s19 = sphi %s773_s19, %s833_s19   ;;  %s728_s18 = sphi %s771_s18, %s832_s18  }
   0x3   : > { %p30_p1 = scmp.ge.s32.totalorder %s28_s21, 2  ;;  %p241_p2 = scmp.lt.s32.totalorder %s736_s20, 3 }
   0x5   : > { %s835_s21 = smov (%p30_p1, %s28_s21), 0  ;;  %p242_p3 = pnand %p659_p0, %p241_p2 }
   0x6   : > { %p294_p4 = scmp.lt.s32.totalorder (!%p242_p3), %s728_s18, 1  ;;  %v738_v0 = vmov (!%p242_p3), 0.0   ;;  %vm739_vm0 = vmmov (!%p242_p3), 0   ;;  %v740_v5 = vmov (!%p242_p3), 0   ;;  %vm411_vm3 = vcmask (!%p242_p3), 26624  }
   0x7   : > { %245 = sbr.rel (%p242_p3) target bundleno = 761 (0x2f9), region = 36  ;;  %673 = vmatprep.subr.mxu0 (!%p242_p3), %v738_v0  ;;  %675 = vmatprep.mubr.msk.f32.mxu0 (!%p242_p3), %vm739_vm0, %v738_v0  ;;  %vm427_vm4 = vcmask (!%p242_p3), 1043456   ;;  %vm423_vm5 = vcmask (!%p242_p3), 31744   ;;  %vm502_vm6 = vcmask (!%p242_p3), 518144  }
   0x8   : > { %678 = vmatprep.subr.mxu1 (!%p242_p3), %v738_v0  ;;  %680 = vmatprep.mubr.msk.f32.mxu1 (!%p242_p3), %vm739_vm0, %v738_v0 }
   0xe   : > { %s837_s18 = smov (!%p294_p4, %s728_s18), 1 }
   0xf   : > { %s789_s22 = sshll.u32 %s837_s18, 2  ;;  %s314_s6 = scalar_lea.vmem %s829_s3, %s837_s18 }
  0x10   : > { %s304_s25 = scalar_lea.vmem %s827_s1, %s789_s22  ;;  %s300_s28 = scalar_lea.vmem %s826_s0, %s789_s22  ;;  %v405_v4 = vld [vmem:[%s314_s6] sm:$0x1] }
  0x11   : > { %v333_v1 = vld [vmem:[%s304_s25] sm:$0xf]  ;;  %vm406_vm1 = vnez %v405_v4  ;;  %s308_s9 = scalar_lea.vmem %s828_s2, %s789_s22  ;;  %s321_s12 = scalar_lea.vmem %s830_s4, %s789_s22 }
  0x12   : > { %674 = vmatpush3.xpose.msra.mxu0 %v333_v1  ;;  %v331_v2 = vld [vmem:[%s300_s28] sm:$0x7]  ;;  %v407_v6 = vsel %vm406_vm1, 16843009, %v740_v5  ;;  %s328_s15 = scalar_lea.vmem %s831_s5, %s789_s22 }
  0x13   : > { %v332_v3 = vmul.f32 0.088388346, %v331_v2  ;;  %v408_v7 = vunpack.c.0.s8 %v407_v6  ;;  %v334_v17 = vld [vmem:[%s308_s9] sm:$0xf] }
  0x14   : > { %679 = vmatpush3.msk.msra.mxu1 %vm427_vm4, %v334_v17 }
  0x15   : > { %676 = vmatmul.mubr.f32.vlgmr.msra.gmra.mrb[0].mxu0 %v332_v3  ;;  %vm409_vm2 = vcmp.ne.s32.totalorder %v408_v7, 0 }
  0xe8   : > { %v401_v8 = vpop.f32.mrb[0].mxu0 }
  0xe9   : > { %v410_v9 = vsel %vm409_vm2, -1e+30, %v401_v8  ;;  %v677_v10 = vpop.f32.mrb[1].mxu0 }
  0xea   : > { %v412_v11 = vsel %vm411_vm3, %v410_v9, -inf }
  0xeb   : > { %413 = vmax.xlane.f32.xlu0 %v412_v11 }
 0x178   : > { %v414_v12 = vpop.xlane.xlu0 %413 }
 0x179   : > { %v415_v13 = vsub.f32 %v410_v9, %v414_v12 }
 0x17b   : > { %v416_v14 = vmul.f32 1.442695, %v415_v13 }
 0x17d   : > { %710 = vpow2.f32 %v416_v14 }
 0x187   : > { %v711_v15 = vpop.eup %710 }
 0x188   : > { %v418_v16 = vsel %vm411_vm3, %v711_v15, 0.0 }
 0x189   : > { %419 = vadd.xlane.f32.xlu0 %v418_v16 }
 0x216   : > { %v420_v18 = vpop.xlane.xlu0 %419 }
 0x217   : > { %712 = vrcp.f32 %v420_v18 }
 0x221   : > { %v713_v19 = vpop.eup %712 }
 0x222   : > { %v422_v20 = vmul.f32 %v713_v19, %v711_v15 }
 0x224   : > { %681 = vmatmul.mubr.msk.f32.vlgmr.msra.gmra.mrb[0].mxu1 %vm423_vm5, %v422_v20  ;;  %501 = vst.msk [vmem:[%s321_s12] sm:$0x7] %vm411_vm3, %v422_v20 }
 0x2f7   : > { %v497_v21 = vpop.f32.mrb[0].mxu1 }
 0x2f8   : > { %503 = vst.msk [vmem:[%s328_s15] sm:$0x7] %vm502_vm6, %v497_v21  ;;  %v682_v22 = vpop.f32.mrb[1].mxu1 }
 0x2f9 PF: > { %s16_s20 = sadd.s32 1, %s736_s20   ;;  %s832_s18 = smov %s732_s19 }
 0x2fa   : > { %p13_p5 = scmp.ge.s32.totalorder %s16_s20, 4   ;;  %s833_s19 = smov %s835_s21 }
 0x2fc   :  { %15 = sbr.rel (!%p13_p5) target bundleno = 2 (0x2), region = 87 }

</bundles_post_ra>
